<compile_context>
chip_gen: v5e
topology: v5e:2x2
jax: 0.10.0
libtpu: 0.0.40
codegen_flags: <defaults>
</compile_context>

<pallas_src>
import functools
import math

import jax
import jax.numpy as jnp
from jax.experimental import pallas as pl
from jax.experimental.pallas import tpu as pltpu


def _mha_lora_kernel(act_ref, w_ref, b_ref, wm_ref, bm_ref, o_ref, *,
                     batch, seq, embed, heads, d_k):
    f32 = jnp.float32
    E = embed

    # ---- (1) Single fused projection matmul --------------------------------------
    # acts = [query | key | value] (B*L, 3E) bf16; w = blockdiag(W_v_eff, W_k,
    # W_q_eff/sqrt(d_k)) (3E, 3E) bf16.  One MXU pass, f32 accumulation.
    acts = act_ref[...]                                                     # (BL, 3E)
    proj = jnp.dot(acts, w_ref[...], preferred_element_type=f32) + b_ref[...]  # (BL, 3E) f32

    value_p = proj[:, 0:E]          # value_proj = linear_v(Q_lora)   (softmax @ this)
    key_p   = proj[:, E:2 * E]      # key_proj   = linear_k(K)
    query_p = proj[:, 2 * E:3 * E]  # query_proj = linear_q(V_lora), 1/sqrt(d_k) pre-folded

    # ---- (2) Head split: static slices + leading-axis stack ----------------------
    # (BL, E) -> (B*H, L, d_k) without lane<->sublane reshapes or >2D transposes.
    def to_groups(x):
        return jnp.stack(
            [x[b * seq:(b + 1) * seq, h * d_k:(h + 1) * d_k]
             for b in range(batch) for h in range(heads)],
            axis=0)

    q_g = to_groups(query_p)   # (B*H, L, d_k) f32
    k_g = to_groups(key_p)
    v_g = to_groups(value_p)

    # ---- (3) Batched attention core (f32 softmax) ---------------------------------
    scores = jnp.einsum('gqd,gkd->gqk', q_g, k_g,
                        preferred_element_type=f32)                         # (B*H, L, L)
    # TODO(synk): attention-mask path (masked_fill -> -1e9) not implemented; mask=None only.
    m = jnp.max(scores, axis=-1, keepdims=True)
    p = jnp.exp(scores - m)
    denom = jnp.sum(p, axis=-1, keepdims=True)
    p = p * pl.reciprocal(denom, approx=True)   # divide -> EUP slot, frees VALU
    # dropout == identity (eval mode)
    att = jnp.einsum('gqk,gkd->gqd', p, v_g,
                     preferred_element_type=f32)                            # (B*H, L, d_k)

    # ---- (4) Re-pack to a (BL, E) slab and do ONE K=E merge matmul ----------------
    rows = [jnp.concatenate([att[b * heads + h] for h in range(heads)], axis=-1)
            for b in range(batch)]                                          # B x (L, E)
    att_slab = jnp.concatenate(rows, axis=0)                                # (BL, E) f32

    out = jnp.dot(att_slab.astype(wm_ref.dtype), wm_ref[...],
                  preferred_element_type=f32) + bm_ref[...]                 # (BL, E) f32
    o_ref[...] = out.astype(o_ref.dtype)


def prepare_weights(params, *, heads, mxu_dtype=jnp.bfloat16):
    """LoRA fold + projection fuse + scale fold (hoisted; cache this for static weights)."""
    E = params["W_v"].shape[0]
    assert E % heads == 0, "heads must divide embed_size"
    d_k = E // heads
    scale = 1.0 / math.sqrt(d_k)

    # value_proj = linear_v(query + query A_q B_q) = query @ (W_v + A_q (B_q W_v)) + b_v
    # query_proj = linear_q(value + value A_v B_v) = value @ (W_q + A_v (B_v W_q)) + b_q
    W_v_eff = params["W_v"] + params["lora_A_q"] @ (params["lora_B_q"] @ params["W_v"])
    W_q_eff = (params["W_q"] + params["lora_A_v"] @ (params["lora_B_v"] @ params["W_q"])) * scale
    b_q_eff = params["b_q"] * scale

    W_fused = jnp.zeros((3 * E, 3 * E), jnp.float32)
    W_fused = W_fused.at[0:E, 0:E].set(W_v_eff)                 # query-input -> value_proj
    W_fused = W_fused.at[E:2 * E, E:2 * E].set(params["W_k"])   # key-input   -> key_proj
    W_fused = W_fused.at[2 * E:3 * E, 2 * E:3 * E].set(W_q_eff) # value-input -> query_proj (scaled)
    b_fused = jnp.concatenate([params["b_v"], params["b_k"], b_q_eff], axis=-1)  # (1, 3E)

    return {
        "w_fused": W_fused.astype(mxu_dtype),
        "b_fused": b_fused.astype(jnp.float32),
        "w_merge": params["W_merge"].astype(mxu_dtype),
        "b_merge": params["b_merge"].astype(jnp.float32),
    }


@functools.partial(jax.jit, static_argnames=("heads",))
def mha_lora_pallas(query, key, value, prepared, *, heads):
    B, L, E = query.shape
    assert E % heads == 0, "heads must divide embed_size"
    d_k = E // heads

    # Layout plumbing (wrapper-side): batch-folded, feature-concatenated activation slab.
    acts = jnp.concatenate([query, key, value], axis=-1).reshape(B * L, 3 * E)
    acts = acts.astype(prepared["w_fused"].dtype)   # bf16 MXU inputs (v6e/v7x native)

    kernel = functools.partial(_mha_lora_kernel,
                               batch=B, seq=L, embed=E, heads=heads, d_k=d_k)
    vmem = pl.BlockSpec(memory_space=pltpu.MemorySpace.VMEM)

    out = pl.pallas_call(
        kernel,
        out_shape=jax.ShapeDtypeStruct((B * L, E), jnp.float32),
        in_specs=[vmem] * 5,
        out_specs=vmem,
        # No grid: the whole (batch-folded) problem is one VMEM-resident block; a
        # grid=(B,) loop on a single TensorCore only added pipeline overhead here.
    )(acts, prepared["w_fused"], prepared["b_fused"],
      prepared["w_merge"], prepared["b_merge"])

    return out.reshape(B, L, E).astype(query.dtype)


def mha_lora_reference(query, key, value, params, *, heads):
    """Pure-JAX reference mirroring the PyTorch forward (dropout = identity, mask=None)."""
    B, L, E = query.shape
    d_k = E // heads
    Q = query + (query @ params["lora_A_q"]) @ params["lora_B_q"]
    K = key
    V = value + (value @ params["lora_A_v"]) @ params["lora_B_v"]
    # MultiHeadAttention.forward(v=Q, k=K, q=V)
    v_p = Q @ params["W_v"] + params["b_v"]
    k_p = K @ params["W_k"] + params["b_k"]
    q_p = V @ params["W_q"] + params["b_q"]

    def split(x):  # (B, L, E) -> (B, H, L, d_k)
        return x.reshape(B, L, heads, d_k).transpose(0, 2, 1, 3)

    qh, kh, vh = split(q_p), split(k_p), split(v_p)
    scores = jnp.einsum("bhqd,bhkd->bhqk", qh, kh) / math.sqrt(d_k)
    att = jax.nn.softmax(scores, axis=-1)
    out = jnp.einsum("bhqk,bhkd->bhqd", att, vh)
    out = out.transpose(0, 2, 1, 3).reshape(B, L, E)
    return out @ params["W_merge"] + params["b_merge"]


def make_params(key, embed_size, rank):
    ks = jax.random.split(key, 12)
    s = 0.02
    return {
        # LoRA adapters (non-zero so the LoRA path is actually exercised; the reference
        # module zeros lora_B_* at init, which would make LoRA a no-op).
        "lora_A_q": jax.random.normal(ks[0], (embed_size, rank), jnp.float32) * s,
        "lora_B_q": jax.random.normal(ks[1], (rank, embed_size), jnp.float32) * s,
        "lora_A_v": jax.random.normal(ks[2], (embed_size, rank), jnp.float32) * s,
        "lora_B_v": jax.random.normal(ks[3], (rank, embed_size), jnp.float32) * s,
        # Linear weights stored as (in, out) (already transposed vs. torch's (out, in)).
        "W_v": jax.random.normal(ks[4], (embed_size, embed_size), jnp.float32) * s,
        "b_v": jax.random.normal(ks[5], (1, embed_size), jnp.float32) * s,
        "W_k": jax.random.normal(ks[6], (embed_size, embed_size), jnp.float32) * s,
        "b_k": jax.random.normal(ks[7], (1, embed_size), jnp.float32) * s,
        "W_q": jax.random.normal(ks[8], (embed_size, embed_size), jnp.float32) * s,
        "b_q": jax.random.normal(ks[9], (1, embed_size), jnp.float32) * s,
        "W_merge": jax.random.normal(ks[10], (embed_size, embed_size), jnp.float32) * s,
        "b_merge": jax.random.normal(ks[11], (1, embed_size), jnp.float32) * s,
    }


if __name__ == "__main__":
    B, L, E, H, R = 2, 8, 32, 4, 4
    root = jax.random.PRNGKey(0)
    k_q, k_k, k_v, k_p = jax.random.split(root, 4)

    query = jax.random.normal(k_q, (B, L, E), jnp.float32)
    key_in = jax.random.normal(k_k, (B, L, E), jnp.float32)
    value = jax.random.normal(k_v, (B, L, E), jnp.float32)
    params = make_params(k_p, E, R)

    prepared = prepare_weights(params, heads=H)   # hoisted / cacheable weight prep
    out = mha_lora_pallas(query, key_in, value, prepared, heads=H)
    out = jax.block_until_ready(out)

    ref = mha_lora_reference(query, key_in, value, params, heads=H)
    assert out.shape == (B, L, E)
    # Tolerance covers bf16 MXU inputs (f32 accumulation), the approx (EUP) reciprocal in
    # the softmax, and the LoRA-fold reassociation; all are << 1e-3 at these magnitudes.
    assert jnp.allclose(out, ref, atol=2e-3, rtol=2e-3), "Pallas output mismatch vs reference"

    print("KERNEL_OK")
</pallas_src>

<mosaic_0001>
module attributes {stable_mosaic.version = 11 : i64} {
  func.func @_mha_lora_kernel(%arg0: memref<16x96xbf16, #tpu.memory_space<vmem>>, %arg1: memref<96x96xbf16, #tpu.memory_space<vmem>>, %arg2: memref<1x96xf32, #tpu.memory_space<vmem>>, %arg3: memref<32x32xbf16, #tpu.memory_space<vmem>>, %arg4: memref<1x32xf32, #tpu.memory_space<vmem>>, %arg5: memref<16x32xf32, #tpu.memory_space<vmem>>) attributes {dimension_semantics = [], scalar_prefetch = 0 : i64, scratch_operands = 0 : i64, tpu.core_type = #tpu.core_type<tc>} {
    %c0 = arith.constant 0 : index
    %c0_0 = arith.constant 0 : index
    %0 = vector.load %arg0[%c0, %c0_0] : memref<16x96xbf16, #tpu.memory_space<vmem>>, vector<16x96xbf16>
    %c0_1 = arith.constant 0 : index
    %c0_2 = arith.constant 0 : index
    %1 = vector.load %arg1[%c0_1, %c0_2] : memref<96x96xbf16, #tpu.memory_space<vmem>>, vector<96x96xbf16>
    %cst = arith.constant dense<0.000000e+00> : vector<16x96xf32>
    %2 = tpu.matmul %0, %1, %cst {dimension_numbers = #tpu.dot_dimension_numbers<[1], [0], [0], [1], [0, 0, 1, 1], [], []>} : vector<16x96xbf16>, vector<96x96xbf16>, vector<16x96xf32> -> vector<16x96xf32>
    %c0_3 = arith.constant 0 : index
    %c0_4 = arith.constant 0 : index
    %3 = vector.load %arg2[%c0_3, %c0_4] : memref<1x96xf32, #tpu.memory_space<vmem>>, vector<1x96xf32>
    %4 = vector.broadcast %3 : vector<1x96xf32> to vector<16x96xf32>
    %5 = arith.addf %2, %4 : vector<16x96xf32>
    %6 = vector.extract_strided_slice %5 {offsets = [0, 0], sizes = [16, 32], strides = [1, 1]} : vector<16x96xf32> to vector<16x32xf32>
    %7 = vector.extract_strided_slice %5 {offsets = [0, 32], sizes = [16, 32], strides = [1, 1]} : vector<16x96xf32> to vector<16x32xf32>
    %8 = vector.extract_strided_slice %5 {offsets = [0, 64], sizes = [16, 32], strides = [1, 1]} : vector<16x96xf32> to vector<16x32xf32>
    %9 = vector.extract_strided_slice %8 {offsets = [0, 0], sizes = [8, 8], strides = [1, 1]} : vector<16x32xf32> to vector<8x8xf32>
    %10 = vector.extract_strided_slice %8 {offsets = [0, 8], sizes = [8, 8], strides = [1, 1]} : vector<16x32xf32> to vector<8x8xf32>
    %11 = vector.extract_strided_slice %8 {offsets = [0, 16], sizes = [8, 8], strides = [1, 1]} : vector<16x32xf32> to vector<8x8xf32>
    %12 = vector.extract_strided_slice %8 {offsets = [0, 24], sizes = [8, 8], strides = [1, 1]} : vector<16x32xf32> to vector<8x8xf32>
    %13 = vector.extract_strided_slice %8 {offsets = [8, 0], sizes = [8, 8], strides = [1, 1]} : vector<16x32xf32> to vector<8x8xf32>
    %14 = vector.extract_strided_slice %8 {offsets = [8, 8], sizes = [8, 8], strides = [1, 1]} : vector<16x32xf32> to vector<8x8xf32>
    %15 = vector.extract_strided_slice %8 {offsets = [8, 16], sizes = [8, 8], strides = [1, 1]} : vector<16x32xf32> to vector<8x8xf32>
    %16 = vector.extract_strided_slice %8 {offsets = [8, 24], sizes = [8, 8], strides = [1, 1]} : vector<16x32xf32> to vector<8x8xf32>
    %17 = vector.shape_cast %9 : vector<8x8xf32> to vector<1x8x8xf32>
    %18 = vector.shape_cast %10 : vector<8x8xf32> to vector<1x8x8xf32>
    %19 = vector.shape_cast %11 : vector<8x8xf32> to vector<1x8x8xf32>
    %20 = vector.shape_cast %12 : vector<8x8xf32> to vector<1x8x8xf32>
    %21 = vector.shape_cast %13 : vector<8x8xf32> to vector<1x8x8xf32>
    %22 = vector.shape_cast %14 : vector<8x8xf32> to vector<1x8x8xf32>
    %23 = vector.shape_cast %15 : vector<8x8xf32> to vector<1x8x8xf32>
    %24 = vector.shape_cast %16 : vector<8x8xf32> to vector<1x8x8xf32>
    %25 = tpu.concatenate %17, %18, %19, %20, %21, %22, %23, %24 in 0 : vector<1x8x8xf32>, vector<1x8x8xf32>, vector<1x8x8xf32>, vector<1x8x8xf32>, vector<1x8x8xf32>, vector<1x8x8xf32>, vector<1x8x8xf32>, vector<1x8x8xf32> -> vector<8x8x8xf32>
    %26 = vector.extract_strided_slice %7 {offsets = [0, 0], sizes = [8, 8], strides = [1, 1]} : vector<16x32xf32> to vector<8x8xf32>
    %27 = vector.extract_strided_slice %7 {offsets = [0, 8], sizes = [8, 8], strides = [1, 1]} : vector<16x32xf32> to vector<8x8xf32>
    %28 = vector.extract_strided_slice %7 {offsets = [0, 16], sizes = [8, 8], strides = [1, 1]} : vector<16x32xf32> to vector<8x8xf32>
    %29 = vector.extract_strided_slice %7 {offsets = [0, 24], sizes = [8, 8], strides = [1, 1]} : vector<16x32xf32> to vector<8x8xf32>
    %30 = vector.extract_strided_slice %7 {offsets = [8, 0], sizes = [8, 8], strides = [1, 1]} : vector<16x32xf32> to vector<8x8xf32>
    %31 = vector.extract_strided_slice %7 {offsets = [8, 8], sizes = [8, 8], strides = [1, 1]} : vector<16x32xf32> to vector<8x8xf32>
    %32 = vector.extract_strided_slice %7 {offsets = [8, 16], sizes = [8, 8], strides = [1, 1]} : vector<16x32xf32> to vector<8x8xf32>
    %33 = vector.extract_strided_slice %7 {offsets = [8, 24], sizes = [8, 8], strides = [1, 1]} : vector<16x32xf32> to vector<8x8xf32>
    %34 = vector.shape_cast %26 : vector<8x8xf32> to vector<1x8x8xf32>
    %35 = vector.shape_cast %27 : vector<8x8xf32> to vector<1x8x8xf32>
    %36 = vector.shape_cast %28 : vector<8x8xf32> to vector<1x8x8xf32>
    %37 = vector.shape_cast %29 : vector<8x8xf32> to vector<1x8x8xf32>
    %38 = vector.shape_cast %30 : vector<8x8xf32> to vector<1x8x8xf32>
    %39 = vector.shape_cast %31 : vector<8x8xf32> to vector<1x8x8xf32>
    %40 = vector.shape_cast %32 : vector<8x8xf32> to vector<1x8x8xf32>
    %41 = vector.shape_cast %33 : vector<8x8xf32> to vector<1x8x8xf32>
    %42 = tpu.concatenate %34, %35, %36, %37, %38, %39, %40, %41 in 0 : vector<1x8x8xf32>, vector<1x8x8xf32>, vector<1x8x8xf32>, vector<1x8x8xf32>, vector<1x8x8xf32>, vector<1x8x8xf32>, vector<1x8x8xf32>, vector<1x8x8xf32> -> vector<8x8x8xf32>
    %43 = vector.extract_strided_slice %6 {offsets = [0, 0], sizes = [8, 8], strides = [1, 1]} : vector<16x32xf32> to vector<8x8xf32>
    %44 = vector.extract_strided_slice %6 {offsets = [0, 8], sizes = [8, 8], strides = [1, 1]} : vector<16x32xf32> to vector<8x8xf32>
    %45 = vector.extract_strided_slice %6 {offsets = [0, 16], sizes = [8, 8], strides = [1, 1]} : vector<16x32xf32> to vector<8x8xf32>
    %46 = vector.extract_strided_slice %6 {offsets = [0, 24], sizes = [8, 8], strides = [1, 1]} : vector<16x32xf32> to vector<8x8xf32>
    %47 = vector.extract_strided_slice %6 {offsets = [8, 0], sizes = [8, 8], strides = [1, 1]} : vector<16x32xf32> to vector<8x8xf32>
    %48 = vector.extract_strided_slice %6 {offsets = [8, 8], sizes = [8, 8], strides = [1, 1]} : vector<16x32xf32> to vector<8x8xf32>
    %49 = vector.extract_strided_slice %6 {offsets = [8, 16], sizes = [8, 8], strides = [1, 1]} : vector<16x32xf32> to vector<8x8xf32>
    %50 = vector.extract_strided_slice %6 {offsets = [8, 24], sizes = [8, 8], strides = [1, 1]} : vector<16x32xf32> to vector<8x8xf32>
    %51 = vector.shape_cast %43 : vector<8x8xf32> to vector<1x8x8xf32>
    %52 = vector.shape_cast %44 : vector<8x8xf32> to vector<1x8x8xf32>
    %53 = vector.shape_cast %45 : vector<8x8xf32> to vector<1x8x8xf32>
    %54 = vector.shape_cast %46 : vector<8x8xf32> to vector<1x8x8xf32>
    %55 = vector.shape_cast %47 : vector<8x8xf32> to vector<1x8x8xf32>
    %56 = vector.shape_cast %48 : vector<8x8xf32> to vector<1x8x8xf32>
    %57 = vector.shape_cast %49 : vector<8x8xf32> to vector<1x8x8xf32>
    %58 = vector.shape_cast %50 : vector<8x8xf32> to vector<1x8x8xf32>
    %59 = tpu.concatenate %51, %52, %53, %54, %55, %56, %57, %58 in 0 : vector<1x8x8xf32>, vector<1x8x8xf32>, vector<1x8x8xf32>, vector<1x8x8xf32>, vector<1x8x8xf32>, vector<1x8x8xf32>, vector<1x8x8xf32>, vector<1x8x8xf32> -> vector<8x8x8xf32>
    "tpu.trace_start"() <{level = 10 : i32, message = "gqd,gkd->gqk"}> : () -> ()
    %cst_5 = arith.constant dense<0.000000e+00> : vector<8x8x8xf32>
    %60 = tpu.matmul %25, %42, %cst_5 {dimension_numbers = #tpu.dot_dimension_numbers<[2], [2], [1], [1], [0, 0, 0, 1, 1, 1], [0], [0]>} : vector<8x8x8xf32>, vector<8x8x8xf32>, vector<8x8x8xf32> -> vector<8x8x8xf32>
    "tpu.trace_stop"() : () -> ()
    %cst_6 = arith.constant dense<0xFF800000> : vector<8x8xf32>
    %61 = vector.multi_reduction <maximumf>, %60, %cst_6 [2] : vector<8x8x8xf32> to vector<8x8xf32>
    %62 = vector.shape_cast %61 : vector<8x8xf32> to vector<8x8x1xf32>
    %63 = vector.broadcast %62 : vector<8x8x1xf32> to vector<8x8x8xf32>
    %64 = arith.subf %60, %63 : vector<8x8x8xf32>
    %65 = math.exp %64 : vector<8x8x8xf32>
    %cst_7 = arith.constant dense<0.000000e+00> : vector<8x8xf32>
    %66 = vector.multi_reduction <add>, %65, %cst_7 [2] : vector<8x8x8xf32> to vector<8x8xf32>
    %67 = vector.shape_cast %66 : vector<8x8xf32> to vector<8x8x1xf32>
    %68 = tpu.reciprocal %67 {approx = true} : vector<8x8x1xf32> -> vector<8x8x1xf32>
    %69 = vector.broadcast %68 : vector<8x8x1xf32> to vector<8x8x8xf32>
    %70 = arith.mulf %65, %69 : vector<8x8x8xf32>
    "tpu.trace_start"() <{level = 10 : i32, message = "gqk,gkd->gqd"}> : () -> ()
    %cst_8 = arith.constant dense<0.000000e+00> : vector<8x8x8xf32>
    %71 = tpu.matmul %70, %59, %cst_8 {dimension_numbers = #tpu.dot_dimension_numbers<[2], [1], [1], [2], [0, 0, 0, 1, 1, 2], [0], [0]>} : vector<8x8x8xf32>, vector<8x8x8xf32>, vector<8x8x8xf32> -> vector<8x8x8xf32>
    "tpu.trace_stop"() : () -> ()
    %72 = vector.extract_strided_slice %71 {offsets = [0, 0, 0], sizes = [1, 8, 8], strides = [1, 1, 1]} : vector<8x8x8xf32> to vector<1x8x8xf32>
    %73 = vector.shape_cast %72 : vector<1x8x8xf32> to vector<8x8xf32>
    %74 = vector.extract_strided_slice %71 {offsets = [1, 0, 0], sizes = [1, 8, 8], strides = [1, 1, 1]} : vector<8x8x8xf32> to vector<1x8x8xf32>
    %75 = vector.shape_cast %74 : vector<1x8x8xf32> to vector<8x8xf32>
    %76 = vector.extract_strided_slice %71 {offsets = [2, 0, 0], sizes = [1, 8, 8], strides = [1, 1, 1]} : vector<8x8x8xf32> to vector<1x8x8xf32>
    %77 = vector.shape_cast %76 : vector<1x8x8xf32> to vector<8x8xf32>
    %78 = vector.extract_strided_slice %71 {offsets = [3, 0, 0], sizes = [1, 8, 8], strides = [1, 1, 1]} : vector<8x8x8xf32> to vector<1x8x8xf32>
    %79 = vector.shape_cast %78 : vector<1x8x8xf32> to vector<8x8xf32>
    %80 = tpu.concatenate %73, %75, %77, %79 in 1 : vector<8x8xf32>, vector<8x8xf32>, vector<8x8xf32>, vector<8x8xf32> -> vector<8x32xf32>
    %81 = vector.extract_strided_slice %71 {offsets = [4, 0, 0], sizes = [1, 8, 8], strides = [1, 1, 1]} : vector<8x8x8xf32> to vector<1x8x8xf32>
    %82 = vector.shape_cast %81 : vector<1x8x8xf32> to vector<8x8xf32>
    %83 = vector.extract_strided_slice %71 {offsets = [5, 0, 0], sizes = [1, 8, 8], strides = [1, 1, 1]} : vector<8x8x8xf32> to vector<1x8x8xf32>
    %84 = vector.shape_cast %83 : vector<1x8x8xf32> to vector<8x8xf32>
    %85 = vector.extract_strided_slice %71 {offsets = [6, 0, 0], sizes = [1, 8, 8], strides = [1, 1, 1]} : vector<8x8x8xf32> to vector<1x8x8xf32>
    %86 = vector.shape_cast %85 : vector<1x8x8xf32> to vector<8x8xf32>
    %87 = vector.extract_strided_slice %71 {offsets = [7, 0, 0], sizes = [1, 8, 8], strides = [1, 1, 1]} : vector<8x8x8xf32> to vector<1x8x8xf32>
    %88 = vector.shape_cast %87 : vector<1x8x8xf32> to vector<8x8xf32>
    %89 = tpu.concatenate %82, %84, %86, %88 in 1 : vector<8x8xf32>, vector<8x8xf32>, vector<8x8xf32>, vector<8x8xf32> -> vector<8x32xf32>
    %90 = tpu.concatenate %80, %89 in 0 : vector<8x32xf32>, vector<8x32xf32> -> vector<16x32xf32>
    %91 = arith.truncf %90 : vector<16x32xf32> to vector<16x32xbf16>
    %c0_9 = arith.constant 0 : index
    %c0_10 = arith.constant 0 : index
    %92 = vector.load %arg3[%c0_9, %c0_10] : memref<32x32xbf16, #tpu.memory_space<vmem>>, vector<32x32xbf16>
    %cst_11 = arith.constant dense<0.000000e+00> : vector<16x32xf32>
    %93 = tpu.matmul %91, %92, %cst_11 {dimension_numbers = #tpu.dot_dimension_numbers<[1], [0], [0], [1], [0, 0, 1, 1], [], []>} : vector<16x32xbf16>, vector<32x32xbf16>, vector<16x32xf32> -> vector<16x32xf32>
    %c0_12 = arith.constant 0 : index
    %c0_13 = arith.constant 0 : index
    %94 = vector.load %arg4[%c0_12, %c0_13] : memref<1x32xf32, #tpu.memory_space<vmem>>, vector<1x32xf32>
    %95 = vector.broadcast %94 : vector<1x32xf32> to vector<16x32xf32>
    %96 = arith.addf %93, %95 : vector<16x32xf32>
    %c0_14 = arith.constant 0 : index
    %c0_15 = arith.constant 0 : index
    %97 = vector.load %arg5[%c0_14, %c0_15] : memref<16x32xf32, #tpu.memory_space<vmem>>, vector<16x32xf32>
    tpu.vector_store %arg5[%c0_14, %c0_15], %96 {strides = array<i32>} : memref<16x32xf32, #tpu.memory_space<vmem>>, vector<16x32xf32>,
    return
  }
}

</mosaic_0001>

<bundles_post_ra>
// kernel: mha_lora_pallas.1
= control target key start
LH: loop header
LB: loop body
LE: loop exit
PB: predicated region body
PF: predicated region fallthrough
CT: control target
= control target key end

     0   :  { %s996_s0 = inlined_call_operand.vmem [shape: bf16[16,96], index: 0, kind: input, shape index: {}]   ;;  %s997_s1 = inlined_call_operand.vmem [shape: bf16[96,96], index: 1, kind: input, shape index: {}]   ;;  %s998_s2 = inlined_call_operand.vmem [shape: f32[1,96], index: 2, kind: input, shape index: {}]   ;;  %s999_s3 = inlined_call_operand.vmem [shape: bf16[32,32], index: 3, kind: input, shape index: {}]   ;;  %s1000_s4 = inlined_call_operand.vmem [shape: f32[1,32], index: 4, kind: input, shape index: {}]   ;;  %s1001_s5 = inlined_call_operand.hbm [shape: f32[16,32], index: 5, kind: output, shape index: {}]  }
   0x1   :  { %v775_v0 = vld [vmem:[%s997_s1 + $0x28] sm:$0xff]  ;;  %v774_v1 = vld [vmem:[%s997_s1 + $0x20] sm:$0xff] }
   0x2   :  { %87 = vmatpush.bf16.msra.mxu0 %v775_v0 }
   0x3   :  { %10 = vsyncpa [#allocation3], 0  ;;  %v773_v2 = vld [vmem:[%s997_s1 + $0x18] sm:$0xff]  ;;  %v772_v3 = vld [vmem:[%s997_s1 + $0x10] sm:$0xff]  ;;  %vm81_vm0 = vcmask 785408   ;;  %s863_s9 = smov 104  }
   0x4   :  { %v771_v4 = vld [vmem:[%s997_s1 + $0x8] sm:$0xff]  ;;  %v770_v5 = vld [vmem:[%s997_s1] sm:$0xff]  ;;  %s864_s10 = smov 120   ;;  %s865_s1 = smov 112   ;;  %vm123_vm1 = vcmask 64512   ;;  %vm629_vm2 = vcmask 130048  }
   0x5   :  { %v769_v6 = vld [vmem:[%s996_s0] sm:$0xff]  ;;  %s866_s0 = smov 64   ;;  %s868_s11 = smov 8   ;;  %vm631_vm3 = vcmask 195584   ;;  %vm669_vm4 = vcmask 261120  }
   0x6   :  { %88 = vmatpush.bf16.msra.mxu0 %v774_v1  ;;  %v803_v7 = vld [vmem:[%s998_s2] ss:$0 sm:$0xff]  ;;  %s867_s2 = smov 96   ;;  %s869_s12 = smov 16  }
   0x7   :  { %s870_s13 = smov 24   ;;  %s871_s19 = smov [#allocation2]  }
   0x8   :  { %s693_s20 = sshll.u32 %s871_s19, 4  ;;  %s695_s23 = sshll.u32 %s1001_s5, 4  ;;  %s694_s20 = int_to_ptr.vmem [resolvable:$true] %s693_s20  ;;  %s696_s23 = int_to_ptr.hbm [resolvable:$true] %s695_s23 }
   0x9   :  { %s872_s24 = smov 128  }
   0xa   :  { %89 = vmatpush.bf16.msra.mxu0 %v773_v2 }
   0xe   :  { %90 = vmatpush.bf16.msra.mxu0 %v772_v3 }
  0x12   :  { %91 = vmatpush.bf16.msra.mxu0 %v771_v4 }
  0x16   :  { %92 = vmatpush.bf16.msra.mxu0 %v770_v5 }
  0x19   :  { %735 = vmatmul.msk.bf16.vlgmr.msra.gmra.mxu0 %vm81_vm0, %v769_v6 }
  0x96   :  { %v94_v8 = vpop.f32.mrf.mxu0 }
  0x97   :  { %v95_v9 = vadd.f32 %v803_v7, %v94_v8 }
  0x99   :  { %104 = vrot.lane.b32.xlu1 %v95_v9, %s863_s9  ;;  %100 = vrot.lane.b32.xlu0 %v95_v9, %s864_s10 }
  0x9e   :  { %v96_v10 = vpop.f32.mrf.mxu0 }
  0x9f   :  { %v927_v11 = vadd.f32 %v803_v7, %v96_v10 }
  0xa1   :  { %109 = vrot.lane.b32.xlu2 %v927_v11, %s865_s1  ;;  %107 = vrot.lane.b32.xlu1 %v927_v11, %s864_s10 }
  0xa2   :  { %102 = vrot.lane.b32.xlu0 %v95_v9, %s865_s1 }
  0xa9   :  { %111 = vrot.lane.b32.xlu2 %v927_v11, %s863_s9  ;;  %119 = vrot.lane.b32.xlu1 %v95_v9, %s866_s0 }
  0xaa   :  { %121 = vrot.lane.b32.xlu0 %v95_v9, %s867_s2 }
  0xb1   :  { %234 = vrot.lane.b32.xlu1 %v927_v11, %s867_s2 }
  0xfb   :  { %v933_v12 = vpop.permute.xlu2 %109 }
 0x103   :  { %v112_v13 = vpop.permute.xlu2 %111 }
 0x104   :  { %611 = vmatpush.msrb.mxu0 %v112_v13 }
 0x10b   :  { %v101_v14 = vpop.permute.xlu0 %100  ;;  %v105_v15 = vpop.permute.xlu1 %104 }
 0x10c   :  { %148 = vrot.lane.b32.xlu1 %v101_v14, %s866_s0  ;;  %150 = vrot.lane.b32.xlu2 %v101_v14, %s867_s2 }
 0x113   :  { %v108_v17 = vpop.permute.xlu1 %107 }
 0x114   :  { %v103_v16 = vpop.permute.xlu0 %102  ;;  %232 = vrot.lane.b32.xlu1 %v927_v11, %s866_s0 }
 0x115   :  { %176 = vrot.lane.b32.xlu2 %v103_v16, %s866_s0  ;;  %178 = vrot.lane.b32.xlu0 %v103_v16, %s867_s2 }
 0x11b   :  { %v120_v19 = vpop.permute.xlu1 %119 }
 0x11c   :  { %v122_v18 = vpop.permute.xlu0 %121  ;;  %318 = vrot.lane.b32.xlu1 %v112_v13, %s867_s2 }
 0x11d   :  { %262 = vrot.lane.b32.xlu2 %v108_v17, %s867_s2  ;;  %206 = vrot.lane.b32.xlu0 %v105_v15, %s867_s2 }
 0x11e   :  { %736 = vmatpush.xpose.msk.msra.mxu2 %vm123_vm1, %v122_v18 }
 0x121   :  { %737 = vmatmul.msk.f32.vlgmr.msra.gmra.mxu2 %vm123_vm1, %v120_v19 }
 0x123   :  { %v235_v21 = vpop.permute.xlu1 %234 }
 0x125   :  { %260 = vrot.lane.b32.xlu2 %v108_v17, %s866_s0  ;;  %204 = vrot.lane.b32.xlu0 %v105_v15, %s866_s0 }
 0x12d   :  { %288 = vrot.lane.b32.xlu2 %v933_v12, %s866_s0  ;;  %290 = vrot.lane.b32.xlu0 %v933_v12, %s867_s2 }
 0x135   :  { %316 = vrot.lane.b32.xlu0 %v112_v13, %s866_s0 }
 0x166   :  { %v151_v20 = vpop.permute.xlu2 %150 }
 0x167   :  { %738 = vmatpush.xpose.msk.msrb.mxu2 %vm123_vm1, %v151_v20 }
 0x16b   :  { %744 = vmatpush.xpose.msk.msra.mxu2 %vm123_vm1, %v235_v21 }
 0x16f   :  { %v177_v22 = vpop.permute.xlu2 %176 }
 0x177   :  { %v263_v26 = vpop.permute.xlu2 %262 }
 0x17e   :  { %v149_v23 = vpop.permute.xlu1 %148 }
 0x17f   :  { %739 = vmatmul.msk.f32.vlgmr.msrb.gmra.mxu2 %vm123_vm1, %v149_v23  ;;  %v261_v29 = vpop.permute.xlu2 %260 }
 0x186   :  { %v233_v24 = vpop.permute.xlu1 %232 }
 0x187   :  { %v179_v25 = vpop.permute.xlu0 %178  ;;  %745 = vmatmul.msk.f32.vlgmr.msra.gmra.mxu2 %vm123_vm1, %v233_v24  ;;  %v289_v32 = vpop.permute.xlu2 %288 }
 0x188   :  { %740 = vmatpush.xpose.msk.msra.mxu3 %vm123_vm1, %v179_v25 }
 0x18b   :  { %741 = vmatmul.msk.f32.vlgmr.msra.gmra.mxu3 %vm123_vm1, %v177_v22 }
 0x18c   :  { %746 = vmatpush.xpose.msk.msrb.mxu3 %vm123_vm1, %v263_v26 }
 0x18e   :  { %v319_v27 = vpop.permute.xlu1 %318 }
 0x18f   :  { %v207_v28 = vpop.permute.xlu0 %206  ;;  %750 = vmatpush.xpose.msk.msrb.mxu2 %vm123_vm1, %v319_v27 }
 0x190   :  { %450 = vmatpush.msra.mxu3 %v95_v9  ;;  %742 = vmatpush.xpose.msk.msra.mxu1 %vm123_vm1, %v207_v28 }
 0x193   :  { %496 = vmatpush.msra.mxu2 %v103_v16  ;;  %747 = vmatmul.msk.f32.vlgmr.msrb.gmra.mxu3 %vm123_vm1, %v261_v29 }
 0x194   :  { %519 = vmatpush.msrb.mxu3 %v105_v15 }
 0x197   :  { %v205_v30 = vpop.permute.xlu0 %204 }
 0x198   :  { %743 = vmatmul.msk.f32.vlgmr.msra.gmra.mxu1 %vm123_vm1, %v205_v30 }
 0x19f   :  { %v291_v31 = vpop.permute.xlu0 %290 }
 0x1a0   :  { %748 = vmatpush.xpose.msk.msrb.mxu1 %vm123_vm1, %v291_v31 }
 0x1a3   :  { %749 = vmatmul.msk.f32.vlgmr.msrb.gmra.mxu1 %vm123_vm1, %v289_v32 }
 0x1a4   :  { %473 = vmatpush.msra.mxu1 %v101_v14  ;;  %v145_v33 = vpop.f32.mrf.mxu2 }
 0x1a5   :  { %v344_v34 = vsel %vm123_vm1, %v145_v33, -inf }
 0x1a6   :  { %542 = vmatpush.msrb.mxu1 %v927_v11  ;;  %345 = vmax.xlane.f32.xlu1 %v344_v34 }
 0x1a7   :  { %v317_v35 = vpop.permute.xlu0 %316 }
 0x1a8   :  { %751 = vmatmul.msk.f32.vlgmr.msrb.gmra.mxu2 %vm123_vm1, %v317_v35 }
 0x1a9   :  { %565 = vmatpush.msrb.mxu2 %v108_v17 }
 0x202   :  { %v173_v42 = vpop.f32.mrf.mxu2 }
 0x203   :  { %v347_v46 = vsel %vm123_vm1, %v173_v42, -inf }
 0x20a   :  { %v257_v49 = vpop.f32.mrf.mxu2 }
 0x20b   :  { %v356_v54 = vsel %vm123_vm1, %v257_v49, -inf }
 0x20e   :  { %v201_v36 = vpop.f32.mrf.mxu3 }
 0x20f   :  { %v350_v37 = vsel %vm123_vm1, %v201_v36, -inf }
 0x210   :  { %351 = vmax.xlane.f32.xlu2 %v350_v37 }
 0x215   :  { %v229_v38 = vpop.f32.mrf.mxu1 }
 0x216   :  { %v285_v39 = vpop.f32.mrf.mxu3  ;;  %v353_v40 = vsel %vm123_vm1, %v229_v38, -inf }
 0x217   :  { %354 = vmax.xlane.f32.xlu0 %v353_v40  ;;  %v359_v41 = vsel %vm123_vm1, %v285_v39, -inf }
 0x218   :  { %360 = vmax.xlane.f32.xlu2 %v359_v41 }
 0x219   :  { %v346_v43 = vpop.xlane.xlu1 %345 }
 0x21a   :  { %v368_v44 = vsub.f32 %v145_v33, %v346_v43 }
 0x21c   :  { %v376_v45 = vmul.f32 1.442695, %v368_v44 }
 0x21e   :  { %805 = vpow2.f32 %v376_v45 }
 0x220   :  { %348 = vmax.xlane.f32.xlu2 %v347_v46  ;;  %v313_v47 = vpop.f32.mrf.mxu1 }
 0x221   :  { %v362_v48 = vsel %vm123_vm1, %v313_v47, -inf }
 0x222   :  { %363 = vmax.xlane.f32.xlu1 %v362_v48 }
 0x224   :  { %v806_v50 = vpop.eup %805 }
 0x225   :  { %v392_v51 = vsel %vm123_vm1, %v806_v50, 0.0 }
 0x22a   :  { %393 = vadd.xlane.f32.xlu1 %v392_v51 }
 0x22b   :  { %v341_v52 = vpop.f32.mrf.mxu2 }
 0x22c   :  { %v365_v53 = vsel %vm123_vm1, %v341_v52, -inf }
 0x22d   :  { %366 = vmax.xlane.f32.xlu0 %v365_v53 }
 0x235   :  { %357 = vmax.xlane.f32.xlu0 %v356_v54 }
 0x283   :  { %v352_v55 = vpop.xlane.xlu2 %351 }
 0x284   :  { %v370_v56 = vsub.f32 %v201_v36, %v352_v55 }
 0x286   :  { %v380_v57 = vmul.f32 1.442695, %v370_v56 }
 0x288   :  { %807 = vpow2.f32 %v380_v57 }
 0x28a   :  { %v355_v58 = vpop.xlane.xlu0 %354 }
 0x28b   :  { %v371_v59 = vsub.f32 %v229_v38, %v355_v58  ;;  %v361_v60 = vpop.xlane.xlu2 %360 }
 0x28c   :  { %v373_v61 = vsub.f32 %v285_v39, %v361_v60  ;;  %v777_v60 = vld [vmem:[%s999_s3 + $0x8] sm:$0xff] }
 0x28d   :  { %v382_v62 = vmul.f32 1.442695, %v371_v59 }
 0x28e   :  { %v808_v63 = vpop.eup %807  ;;  %v386_v0 = vmul.f32 1.442695, %v373_v61  ;;  %v776_v61 = vld [vmem:[%s999_s3] sm:$0xff] }
 0x28f   :  { %809 = vpow2.f32 %v382_v62  ;;  %v398_v1 = vsel %vm123_vm1, %v808_v63, 0.0 }
 0x290   :  { %811 = vpow2.f32 %v386_v0  ;;  %399 = vadd.xlane.f32.xlu2 %v398_v1 }
 0x293   :  { %v349_v2 = vpop.xlane.xlu2 %348 }
 0x294   :  { %v369_v3 = vsub.f32 %v173_v42, %v349_v2 }
 0x295   :  { %v810_v4 = vpop.eup %809  ;;  %v364_v5 = vpop.xlane.xlu1 %363 }
 0x296   :  { %v812_v6 = vpop.eup %811  ;;  %v378_v7 = vmul.f32 1.442695, %v369_v3  ;;  %v374_v8 = vsub.f32 %v313_v47, %v364_v5  ;;  %v401_v9 = vsel %vm123_vm1, %v810_v4, 0.0 }
 0x297   :  { %402 = vadd.xlane.f32.xlu1 %v401_v9  ;;  %v407_v10 = vsel %vm123_vm1, %v812_v6, 0.0 }
 0x298   :  { %813 = vpow2.f32 %v378_v7  ;;  %v388_v11 = vmul.f32 1.442695, %v374_v8  ;;  %408 = vadd.xlane.f32.xlu2 %v407_v10 }
 0x29a   :  { %815 = vpow2.f32 %v388_v11 }
 0x29d   :  { %v394_v13 = vpop.xlane.xlu1 %393 }
 0x29e   :  { %v814_v14 = vpop.eup %813  ;;  %817 = vrcp.f32 %v394_v13 }
 0x29f   :  { %v395_v15 = vsel %vm123_vm1, %v814_v14, 0.0 }
 0x2a0   :  { %v816_v16 = vpop.eup %815  ;;  %396 = vadd.xlane.f32.xlu1 %v395_v15  ;;  %v367_v17 = vpop.xlane.xlu0 %366 }
 0x2a1   :  { %v375_v18 = vsub.f32 %v341_v52, %v367_v17  ;;  %v410_v19 = vsel %vm123_vm1, %v816_v16, 0.0 }
 0x2a2   :  { %411 = vadd.xlane.f32.xlu0 %v410_v19 }
 0x2a3   :  { %v390_v20 = vmul.f32 1.442695, %v375_v18 }
 0x2a4   :  { %v818_v21 = vpop.eup %817 }
 0x2a5   :  { %v424_v22 = vmul.f32 %v818_v21, %v806_v50  ;;  %819 = vpow2.f32 %v390_v20 }
 0x2a7   :  { %752 = vmatmul.msk.f32.vlgmr.msra.gmra.mxu3 %vm123_vm1, %v424_v22 }
 0x2a8   :  { %588 = vmatpush.msra.mxu3 %v933_v12  ;;  %v358_v23 = vpop.xlane.xlu0 %357 }
 0x2a9   :  { %v372_v24 = vsub.f32 %v257_v49, %v358_v23 }
 0x2ab   :  { %v820_v25 = vpop.eup %819  ;;  %v384_v26 = vmul.f32 1.442695, %v372_v24 }
 0x2ac   :  { %v413_v27 = vsel %vm123_vm1, %v820_v25, 0.0 }
 0x2ad   :  { %821 = vpow2.f32 %v384_v26  ;;  %414 = vadd.xlane.f32.xlu2 %v413_v27 }
 0x2b3   :  { %v822_v28 = vpop.eup %821 }
 0x2b4   :  { %v404_v29 = vsel %vm123_vm1, %v822_v28, 0.0 }
 0x2b5   :  { %405 = vadd.xlane.f32.xlu0 %v404_v29 }
 0x303   :  { %v400_v30 = vpop.xlane.xlu2 %399 }
 0x304   :  { %823 = vrcp.f32 %v400_v30 }
 0x30a   :  { %v824_v31 = vpop.eup %823  ;;  %v403_v32 = vpop.xlane.xlu1 %402 }
 0x30b   :  { %v426_v33 = vmul.f32 %v824_v31, %v808_v63  ;;  %825 = vrcp.f32 %v403_v32  ;;  %v409_v34 = vpop.xlane.xlu2 %408 }
 0x30c   :  { %827 = vrcp.f32 %v409_v34 }
 0x30d   :  { %754 = vmatmul.msk.f32.vlgmr.msra.gmra.mxu2 %vm123_vm1, %v426_v33 }
 0x311   :  { %v826_v12 = vpop.eup %825 }
 0x312   :  { %v828_v35 = vpop.eup %827  ;;  %v427_v36 = vmul.f32 %v826_v12, %v810_v4 }
 0x313   :  { %v429_v37 = vmul.f32 %v828_v35, %v812_v6  ;;  %v397_v38 = vpop.xlane.xlu1 %396 }
 0x314   :  { %829 = vrcp.f32 %v397_v38  ;;  %755 = vmatmul.msk.f32.vlgmr.msrb.gmra.mxu3 %vm123_vm1, %v427_v36 }
 0x315   :  { %757 = vmatmul.msk.f32.vlgmr.msrb.gmra.mxu2 %vm123_vm1, %v429_v37  ;;  %v412_v39 = vpop.xlane.xlu0 %411 }
 0x316   :  { %831 = vrcp.f32 %v412_v39 }
 0x31a   :  { %v830_v40 = vpop.eup %829 }
 0x31b   :  { %v425_v41 = vmul.f32 %v830_v40, %v814_v14 }
 0x31c   :  { %v832_v42 = vpop.eup %831 }
 0x31d   :  { %v430_v43 = vmul.f32 %v832_v42, %v816_v16  ;;  %753 = vmatmul.msk.f32.vlgmr.msra.gmra.mxu1 %vm123_vm1, %v425_v41  ;;  %v804_v16 = vld [vmem:[%s1000_s4] ss:$0 sm:$0xff] }
 0x31e   :  { %679 = vmatpush.bf16.msra.mxu1 %v777_v60 }
 0x31f   :  { %758 = vmatmul.msk.f32.vlgmr.msra.gmra.mxu3 %vm123_vm1, %v430_v43 }
 0x320   :  { %v415_v44 = vpop.xlane.xlu2 %414 }
 0x321   :  { %833 = vrcp.f32 %v415_v44 }
 0x322   :  { %680 = vmatpush.bf16.msra.mxu1 %v776_v61 }
 0x327   :  { %v834_v45 = vpop.eup %833 }
 0x328   :  { %v406_v46 = vpop.xlane.xlu0 %405  ;;  %v431_v47 = vmul.f32 %v834_v45, %v820_v25 }
 0x329   :  { %835 = vrcp.f32 %v406_v46 }
 0x32a   :  { %759 = vmatmul.msk.f32.vlgmr.msrb.gmra.mxu0 %vm123_vm1, %v431_v47  ;;  %v452_v51 = vpop.f32.mrf.mxu3 }
 0x32f   :  { %v836_v48 = vpop.eup %835 }
 0x330   :  { %v428_v49 = vmul.f32 %v836_v48, %v822_v28 }
 0x332   :  { %756 = vmatmul.msk.f32.vlgmr.msrb.gmra.mxu1 %vm123_vm1, %v428_v49 }
 0x390   :  { %v498_v50 = vpop.f32.mrf.mxu2 }
 0x397   :  { %v521_v52 = vpop.f32.mrf.mxu3 }
 0x398   :  { %v567_v53 = vpop.f32.mrf.mxu2 }
 0x39a   :  { %v475_v54 = vpop.f32.mrf.mxu1 }
 0x39b   :  { %v788_v55 = vpack.i.bf16 %v567_v53, %v475_v54 }
 0x39d   :  { %789 = vrot.lane.b32.xlu1 %v788_v55, %s868_s11 }
 0x3a2   :  { %v590_v56 = vpop.f32.mrf.mxu3 }
 0x3a3   :  { %v793_v57 = vpack.i.bf16 %v590_v56, %v498_v50 }
 0x3a5   :  { %794 = vrot.lane.b32.xlu2 %v793_v57, %s869_s12 }
 0x3a7   :  { %v613_v58 = vpop.f32.mrf.mxu0 }
 0x3a8   :  { %v798_v59 = vpack.i.bf16 %v613_v58, %v521_v52 }
 0x3aa   :  { %799 = vrot.lane.b32.xlu0 %v798_v59, %s870_s13 }
 0x3af   :  { %v544_v2 = vpop.f32.mrf.mxu1 }
 0x3ff   :  { %v795_v1 = vpop.permute.xlu2 %794 }
 0x400   :  { %v797_v5 = vunpack.i.h.bf16 %v795_v1  ;;  %v796_v6 = vunpack.i.l.bf16 %v795_v1 }
 0x40f   :  { %v790_v62 = vpop.permute.xlu1 %789 }
 0x410   :  { %v792_v63 = vunpack.i.h.bf16 %v790_v62  ;;  %v791_v0 = vunpack.i.l.bf16 %v790_v62 }
 0x412   :  { %v628_v3 = vsel %vm123_vm1, %v452_v51, %v791_v0  ;;  %v645_v4 = vsel %vm123_vm1, %v544_v2, %v792_v63 }
 0x413   :  { %v630_v10 = vsel %vm629_vm2, %v628_v3, %v796_v6  ;;  %v646_v11 = vsel %vm629_vm2, %v645_v4, %v797_v5 }
 0x41c   :  { %v800_v7 = vpop.permute.xlu0 %799 }
 0x41d   :  { %v802_v8 = vunpack.i.h.bf16 %v800_v7  ;;  %v801_v9 = vunpack.i.l.bf16 %v800_v7 }
 0x41f   :  { %v647_v13 = vsel %vm631_vm3, %v646_v11, %v802_v8  ;;  %v632_v14 = vsel %vm631_vm3, %v630_v10, %v801_v9 }
 0x420   :  { %v648_v15 = vpack.c.bf16 %v647_v13, %v632_v14 }
 0x422   :  { %768 = vmatmul.msk.bf16.vlgmr.msra.gmra.mxu1 %vm669_vm4, %v648_v15 }
 0x49f   :  { %v682_v17 = vpop.f32.mrf.mxu1 }
 0x4a0   :  { %v683_v18 = vadd.f32 %v804_v16, %v682_v17 }
 0x4a2   :  { %687 = vst.msk [vmem:[#allocation2] sm:$0xff] %vm669_vm4, %v683_v18 }
 0x4a7   :  { %v684_v19 = vpop.f32.mrf.mxu1 }
 0x4a8   :  { %v685_v20 = vadd.f32 %v804_v16, %v684_v19 }
 0x4aa   :  { %688 = vst.msk [vmem:[#allocation2 + $0x8] sm:$0xff] %vm669_vm4, %v685_v20 }
 0x4ab   :  { %701 = dma.vmem_to_hbm [thread:$0]  %s694_s20, 256, %s696_s23, [#allocation3], %s872_s24, %s872_s24, %s868_s11  }
 0x4ac   :  { %861 = dma.done.wait [#allocation3], 256  }
 0x4ad   :  { %862 = vsyncadd [#allocation3], 4294967040 }
 0x4ae   :  { %706 = vsyncpa [#allocation3], 1 }

</bundles_post_ra>
